<compile_context>
chip_gen: v7x
topology: tpu7x:2x2x1
jax: 0.10.0
libtpu: 0.0.40
codegen_flags: <defaults>
</compile_context>

<pallas_src>
import jax
import jax.numpy as jnp
from jax.experimental import pallas as pl
from jax.experimental.pallas import tpu as pltpu


def _round_up(x, m):
    return (x + m - 1) // m * m


def _mlp_tail(h, w2_ref, b2_ref, w3_ref, b3_ref, o_ref):
    """Shared layers 2 & 3: Linear(512,256) -> LeakyReLU(0.2) -> Linear(256,1)."""
    h = jnp.dot(h.astype(jnp.bfloat16), w2_ref[...],
                preferred_element_type=jnp.float32) + b2_ref[...]
    h = jnp.maximum(h, 0.2 * h)                       # LeakyReLU(0.2): single VALU max
    # Final layer (out_features == 1): VPU multiply + XLU row-reduction instead
    # of a 1-column MXU matmul; result is written as a lane-dense (1,1,TB) row.
    w3 = w3_ref[...].astype(jnp.float32)              # (1, 256)
    out = jnp.sum(h * w3, axis=-1) + b3_ref[0]        # (TB,) fp32
    o_ref[...] = out.reshape(1, 1, -1).astype(o_ref.dtype)


def _disc_kernel_cond(x_ref, c_ref, w1_ref, b1_ref, w2_ref, b2_ref,
                      w3_ref, b3_ref, o_ref, xc_ref):
    """Conditioned path: assemble concat([x, con]) in a VMEM scratch tile and
    run a single layer-1 dot against the rejoined W1 (one MXU push sequence)."""
    dx = x_ref.shape[1]
    xc_ref[:, :dx] = x_ref[...]
    xc_ref[:, dx:] = c_ref[...]
    h = jnp.dot(xc_ref[...], w1_ref[...],
                preferred_element_type=jnp.float32) + b1_ref[...]
    h = jnp.maximum(h, 0.2 * h)                       # LeakyReLU(0.2)
    _mlp_tail(h, w2_ref, b2_ref, w3_ref, b3_ref, o_ref)


def _disc_kernel_nocond(x_ref, w1_ref, b1_ref, w2_ref, b2_ref,
                        w3_ref, b3_ref, o_ref):
    """condition_len == 0 path."""
    h = jnp.dot(x_ref[...], w1_ref[...],
                preferred_element_type=jnp.float32) + b1_ref[...]
    h = jnp.maximum(h, 0.2 * h)
    _mlp_tail(h, w2_ref, b2_ref, w3_ref, b3_ref, o_ref)


def discriminator_forward(x, con, params, *, block_b=2048):
    """x: [B, input_feature]; con: [B, condition_len] or None.

    params = (w1, b1, w2, b2, w3, b3); weights bf16 [in, out], biases fp32,
    w3 stored as a (1, 256) row, b3 a (1,) scalar (goes to SMEM)."""
    w1, b1, w2, b2, w3, b3 = params
    have_con = (con is not None) and (con.shape[-1] > 0)

    # Pre-cast activations to bf16: halves input HBM/DMA bytes and removes a
    # per-tile VPU cast (the MXU still accumulates in fp32).
    x = x.astype(jnp.bfloat16)
    if have_con:
        con = con.astype(jnp.bfloat16)

    B = x.shape[0]
    # Batch tile: default 2048 rows (8-aligned).  Clamp so large batches get a
    # grid of >= 2 steps (keeps both v7x TensorCores busy on the "parallel" axis).
    TB = min(block_b, _round_up(max(B, 1), 8))
    if B >= 2048 and _round_up(B, TB) // TB < 2:
        TB = _round_up(pl.cdiv(B, 2), 128)
    B_pad = _round_up(B, TB)
    if B_pad != B:
        x = jnp.pad(x, ((0, B_pad - B), (0, 0)))
        if have_con:
            con = jnp.pad(con, ((0, B_pad - B), (0, 0)))
    num_tiles = B_pad // TB
    grid = (num_tiles,)

    def tile_spec(n_cols):                       # batch-tiled, double-buffered
        return pl.BlockSpec((TB, n_cols), lambda i: (i, 0))

    def resident_spec(shape):                    # same block every step -> VMEM-resident
        return pl.BlockSpec(shape, lambda i: (0, 0))

    # Assemble (arg, spec) pairs in kernel-argument order.
    args, specs = [x], [tile_spec(x.shape[1])]
    if have_con:
        args.append(con)
        specs.append(tile_spec(con.shape[1]))
    args += [w1, b1, w2, b2, w3]
    specs += [resident_spec(w1.shape), resident_spec(b1.shape),
              resident_spec(w2.shape), resident_spec(b2.shape),
              resident_spec(w3.shape)]
    args.append(b3)                              # scalar bias -> SMEM
    specs.append(pl.BlockSpec(memory_space=pltpu.MemorySpace.SMEM))

    d_in = w1.shape[0]
    kernel = _disc_kernel_cond if have_con else _disc_kernel_nocond
    scratch = [pltpu.VMEM((TB, d_in), jnp.bfloat16)] if have_con else []

    flops = 2 * B_pad * (d_in * 512 + 512 * 256 + 256 * 1)
    bytes_accessed = sum(int(a.size) * a.dtype.itemsize for a in args) + B_pad * 4
    cost = pl.CostEstimate(flops=flops, transcendentals=0,
                           bytes_accessed=bytes_accessed)

    out = pl.pallas_call(
        kernel,
        out_shape=jax.ShapeDtypeStruct((num_tiles, 1, TB), jnp.float32),
        grid=grid,
        in_specs=specs,
        out_specs=pl.BlockSpec((1, 1, TB), lambda i: (i, 0, 0)),
        scratch_shapes=scratch,
        compiler_params=pltpu.CompilerParams(
            dimension_semantics=("parallel",),      # shard grid over v7x's 2 TCs
            vmem_limit_bytes=32 * 1024 * 1024,      # ~12 MiB live at TB=2048; safe on all gens
        ),
        cost_estimate=cost,
    )(*args)
    # (num_tiles, 1, TB) row-major == batch order; slice off the pad rows.
    return out.reshape(B_pad, 1)[:B]


def init_params(key, input_feature, condition_len):
    """PyTorch-Linear-style init; weights stored pre-transposed [in, out] in
    bf16 (fp32 accumulation in-kernel), biases fp32."""
    d_in = input_feature + condition_len
    dims = [(d_in, 512), (512, 256), (256, 1)]
    ws, bs = [], []
    for fin, fout in dims:
        key, kw, kb = jax.random.split(key, 3)
        bound = 1.0 / (fin ** 0.5)
        ws.append(jax.random.uniform(kw, (fin, fout), jnp.float32, -bound, bound))
        bs.append(jax.random.uniform(kb, (fout,), jnp.float32, -bound, bound))
    w1, w2, w3 = (w.astype(jnp.bfloat16) for w in ws)
    b1 = bs[0].reshape(1, 512)
    b2 = bs[1].reshape(1, 256)
    w3 = w3.reshape(1, 256)          # row form for the in-kernel VPU reduction
    b3 = bs[2].reshape(1,)           # scalar, goes to SMEM
    return (w1, b1, w2, b2, w3, b3)


def reference_forward(x, con, params):
    """Pure-JAX fp32 reference (same parameter values, concat semantics)."""
    w1, b1, w2, b2, w3, b3 = params
    if con is not None and con.shape[-1] > 0:
        xf = jnp.concatenate([x, con], axis=-1)
    else:
        xf = x
    h = xf @ w1.astype(jnp.float32) + b1
    h = jnp.where(h > 0, h, 0.2 * h)
    h = h @ w2.astype(jnp.float32) + b2
    h = jnp.where(h > 0, h, 0.2 * h)
    return h @ w3.astype(jnp.float32).T + b3


if __name__ == "__main__":
    batch = 8
    input_feature = 24
    condition_len = 8

    key = jax.random.PRNGKey(0)
    key, kx, kc, k3 = jax.random.split(key, 4)
    x = jax.random.normal(kx, (batch, input_feature), jnp.float32)
    con = jax.random.normal(kc, (batch, condition_len), jnp.float32)
    params = init_params(jax.random.PRNGKey(0), input_feature, condition_len)

    # Conditioned path, small batch (single tile).
    out = jax.block_until_ready(discriminator_forward(x, con, params))
    ref = reference_forward(x, con, params)
    assert out.shape == (batch, 1), out.shape
    assert jnp.allclose(out, ref, atol=5e-2, rtol=5e-2)

    # Larger, non-tile-multiple batch with a small explicit tile: exercises the
    # multi-step grid, tail padding, and lane-dense tiled output path.
    B2 = 1000
    k3a, k3b = jax.random.split(k3)
    x2 = jax.random.normal(k3a, (B2, input_feature), jnp.float32)
    con2 = jax.random.normal(k3b, (B2, condition_len), jnp.float32)
    out2 = jax.block_until_ready(discriminator_forward(x2, con2, params, block_b=256))
    ref2 = reference_forward(x2, con2, params)
    assert out2.shape == (B2, 1), out2.shape
    assert jnp.allclose(out2, ref2, atol=5e-2, rtol=5e-2)

    # Same batch through the default TB=2048 path (single big tile).
    out2b = jax.block_until_ready(discriminator_forward(x2, con2, params))
    assert out2b.shape == (B2, 1), out2b.shape
    assert jnp.allclose(out2b, ref2, atol=5e-2, rtol=5e-2)

    # condition_len == 0 path (no concat, single-input kernel variant).
    params_nc = init_params(jax.random.PRNGKey(1), input_feature, 0)
    out3 = jax.block_until_ready(discriminator_forward(x, None, params_nc))
    ref3 = reference_forward(x, None, params_nc)
    assert out3.shape == (batch, 1), out3.shape
    assert jnp.allclose(out3, ref3, atol=5e-2, rtol=5e-2)

    print("KERNEL_OK")
</pallas_src>

<mosaic_0001>
module attributes {stable_mosaic.version = 11 : i64} {
  func.func @_disc_kernel_cond(%arg0: i32, %arg1: memref<8x24xbf16, #tpu.memory_space<vmem>>, %arg2: memref<8x8xbf16, #tpu.memory_space<vmem>>, %arg3: memref<32x512xbf16, #tpu.memory_space<vmem>>, %arg4: memref<1x512xf32, #tpu.memory_space<vmem>>, %arg5: memref<512x256xbf16, #tpu.memory_space<vmem>>, %arg6: memref<1x256xf32, #tpu.memory_space<vmem>>, %arg7: memref<1x256xbf16, #tpu.memory_space<vmem>>, %arg8: memref<1xf32, #tpu.memory_space<smem>>, %arg9: memref<1x1x8xf32, #tpu.memory_space<vmem>>, %arg10: memref<8x32xbf16, #tpu.memory_space<vmem>>) attributes {dimension_semantics = [#tpu.dimension_semantics<parallel>], iteration_bounds = array<i64: 1>, scalar_prefetch = 0 : i64, scratch_operands = 1 : i64, tpu.core_type = #tpu.core_type<tc>, window_params = [{transform_indices = @transform_0, window_bounds = array<i64: 8, 24>}, {transform_indices = @transform_1, window_bounds = array<i64: 8, 8>}, {pipeline_mode = #tpu.pipeline_mode<synchronous>, transform_indices = @transform_2, window_bounds = array<i64: 32, 512>}, {pipeline_mode = #tpu.pipeline_mode<synchronous>, transform_indices = @transform_3, window_bounds = array<i64: 1, 512>}, {pipeline_mode = #tpu.pipeline_mode<synchronous>, transform_indices = @transform_4, window_bounds = array<i64: 512, 256>}, {pipeline_mode = #tpu.pipeline_mode<synchronous>, transform_indices = @transform_5, window_bounds = array<i64: 1, 256>}, {pipeline_mode = #tpu.pipeline_mode<synchronous>, transform_indices = @transform_6, window_bounds = array<i64: 1, 256>}, {transform_indices = @transform_7, window_bounds = array<i64: 1>}, {transform_indices = @transform_8, window_bounds = array<i64: 1, 1, 8>}]} {
    %c0 = arith.constant 0 : index
    %c0_0 = arith.constant 0 : index
    %0 = vector.load %arg1[%c0, %c0_0] : memref<8x24xbf16, #tpu.memory_space<vmem>>, vector<8x24xbf16>
    %c0_1 = arith.constant 0 : index
    %c0_2 = arith.constant 0 : index
    %1 = vector.load %arg10[%c0_1, %c0_2] : memref<8x32xbf16, #tpu.memory_space<vmem>>, vector<8x24xbf16>
    tpu.vector_store %arg10[%c0_1, %c0_2], %0 {strides = array<i32>} : memref<8x32xbf16, #tpu.memory_space<vmem>>, vector<8x24xbf16>,
    %c0_3 = arith.constant 0 : index
    %c0_4 = arith.constant 0 : index
    %2 = vector.load %arg2[%c0_3, %c0_4] : memref<8x8xbf16, #tpu.memory_space<vmem>>, vector<8x8xbf16>
    %c0_5 = arith.constant 0 : index
    %c24 = arith.constant 24 : index
    %3 = vector.load %arg10[%c0_5, %c24] : memref<8x32xbf16, #tpu.memory_space<vmem>>, vector<8x8xbf16>
    tpu.vector_store %arg10[%c0_5, %c24], %2 {strides = array<i32>} : memref<8x32xbf16, #tpu.memory_space<vmem>>, vector<8x8xbf16>,
    %c0_6 = arith.constant 0 : index
    %c0_7 = arith.constant 0 : index
    %4 = vector.load %arg10[%c0_6, %c0_7] : memref<8x32xbf16, #tpu.memory_space<vmem>>, vector<8x32xbf16>
    %c0_8 = arith.constant 0 : index
    %c0_9 = arith.constant 0 : index
    %5 = vector.load %arg3[%c0_8, %c0_9] : memref<32x512xbf16, #tpu.memory_space<vmem>>, vector<32x512xbf16>
    %cst = arith.constant dense<0.000000e+00> : vector<8x512xf32>
    %6 = tpu.matmul %4, %5, %cst {dimension_numbers = #tpu.dot_dimension_numbers<[1], [0], [0], [1], [0, 0, 1, 1], [], []>} : vector<8x32xbf16>, vector<32x512xbf16>, vector<8x512xf32> -> vector<8x512xf32>
    %c0_10 = arith.constant 0 : index
    %c0_11 = arith.constant 0 : index
    %7 = vector.load %arg4[%c0_10, %c0_11] : memref<1x512xf32, #tpu.memory_space<vmem>>, vector<1x512xf32>
    %8 = vector.broadcast %7 : vector<1x512xf32> to vector<8x512xf32>
    %9 = arith.addf %6, %8 : vector<8x512xf32>
    %cst_12 = arith.constant 2.000000e-01 : f32
    %10 = vector.broadcast %cst_12 : f32 to vector<8x512xf32>
    %11 = arith.mulf %10, %9 : vector<8x512xf32>
    %12 = arith.maximumf %9, %11 : vector<8x512xf32>
    %13 = arith.truncf %12 : vector<8x512xf32> to vector<8x512xbf16>
    %c0_13 = arith.constant 0 : index
    %c0_14 = arith.constant 0 : index
    %14 = vector.load %arg5[%c0_13, %c0_14] : memref<512x256xbf16, #tpu.memory_space<vmem>>, vector<512x256xbf16>
    %cst_15 = arith.constant dense<0.000000e+00> : vector<8x256xf32>
    %15 = tpu.matmul %13, %14, %cst_15 {dimension_numbers = #tpu.dot_dimension_numbers<[1], [0], [0], [1], [0, 0, 1, 1], [], []>} : vector<8x512xbf16>, vector<512x256xbf16>, vector<8x256xf32> -> vector<8x256xf32>
    %c0_16 = arith.constant 0 : index
    %c0_17 = arith.constant 0 : index
    %16 = vector.load %arg6[%c0_16, %c0_17] : memref<1x256xf32, #tpu.memory_space<vmem>>, vector<1x256xf32>
    %17 = vector.broadcast %16 : vector<1x256xf32> to vector<8x256xf32>
    %18 = arith.addf %15, %17 : vector<8x256xf32>
    %cst_18 = arith.constant 2.000000e-01 : f32
    %19 = vector.broadcast %cst_18 : f32 to vector<8x256xf32>
    %20 = arith.mulf %19, %18 : vector<8x256xf32>
    %21 = arith.maximumf %18, %20 : vector<8x256xf32>
    %c0_19 = arith.constant 0 : index
    %c0_20 = arith.constant 0 : index
    %22 = vector.load %arg7[%c0_19, %c0_20] : memref<1x256xbf16, #tpu.memory_space<vmem>>, vector<1x256xbf16>
    %23 = arith.extf %22 : vector<1x256xbf16> to vector<1x256xf32>
    %24 = vector.broadcast %23 : vector<1x256xf32> to vector<8x256xf32>
    %25 = arith.mulf %21, %24 : vector<8x256xf32>
    %cst_21 = arith.constant dense<0.000000e+00> : vector<8xf32>
    %26 = vector.multi_reduction <add>, %25, %cst_21 [1] : vector<8x256xf32> to vector<8xf32>
    %c0_22 = arith.constant 0 : index
    %27 = memref.load %arg8[%c0_22] : memref<1xf32, #tpu.memory_space<smem>>
    %28 = vector.broadcast %27 : f32 to vector<8xf32>
    %29 = arith.addf %26, %28 : vector<8xf32>
    %30 = vector.shape_cast %29 : vector<8xf32> to vector<1x1x8xf32>
    %c0_23 = arith.constant 0 : index
    %c0_24 = arith.constant 0 : index
    %c0_25 = arith.constant 0 : index
    %31 = vector.load %arg9[%c0_23, %c0_24, %c0_25] : memref<1x1x8xf32, #tpu.memory_space<vmem>>, vector<1x1x8xf32>
    tpu.vector_store %arg9[%c0_23, %c0_24, %c0_25], %30 {strides = array<i32>} : memref<1x1x8xf32, #tpu.memory_space<vmem>>, vector<1x1x8xf32>,
    return
  }
  func.func @transform_0(%arg0: i32) -> (i32, i32) {
    %c0_i32 = arith.constant 0 : i32
    %c0_i32_0 = arith.constant 0 : i32
    return %arg0, %c0_i32 : i32, i32
  }
  func.func @transform_1(%arg0: i32) -> (i32, i32) {
    %c0_i32 = arith.constant 0 : i32
    %c0_i32_0 = arith.constant 0 : i32
    return %arg0, %c0_i32 : i32, i32
  }
  func.func @transform_2(%arg0: i32) -> (i32, i32) {
    %c0_i32 = arith.constant 0 : i32
    %c0_i32_0 = arith.constant 0 : i32
    %c0_i32_1 = arith.constant 0 : i32
    return %c0_i32, %c0_i32_0 : i32, i32
  }
  func.func @transform_3(%arg0: i32) -> (i32, i32) {
    %c0_i32 = arith.constant 0 : i32
    %c0_i32_0 = arith.constant 0 : i32
    %c0_i32_1 = arith.constant 0 : i32
    return %c0_i32, %c0_i32_0 : i32, i32
  }
  func.func @transform_4(%arg0: i32) -> (i32, i32) {
    %c0_i32 = arith.constant 0 : i32
    %c0_i32_0 = arith.constant 0 : i32
    %c0_i32_1 = arith.constant 0 : i32
    return %c0_i32, %c0_i32_0 : i32, i32
  }
  func.func @transform_5(%arg0: i32) -> (i32, i32) {
    %c0_i32 = arith.constant 0 : i32
    %c0_i32_0 = arith.constant 0 : i32
    %c0_i32_1 = arith.constant 0 : i32
    return %c0_i32, %c0_i32_0 : i32, i32
  }
  func.func @transform_6(%arg0: i32) -> (i32, i32) {
    %c0_i32 = arith.constant 0 : i32
    %c0_i32_0 = arith.constant 0 : i32
    %c0_i32_1 = arith.constant 0 : i32
    return %c0_i32, %c0_i32_0 : i32, i32
  }
  func.func @transform_7(%arg0: i32) -> i32 {
    %c0_i32 = arith.constant 0 : i32
    %c0_i32_0 = arith.constant 0 : i32
    return %c0_i32 : i32
  }
  func.func @transform_8(%arg0: i32) -> (i32, i32, i32) {
    %c0_i32 = arith.constant 0 : i32
    %c0_i32_0 = arith.constant 0 : i32
    %c0_i32_1 = arith.constant 0 : i32
    return %arg0, %c0_i32, %c0_i32_0 : i32, i32, i32
  }
}

</mosaic_0001>

<bundles_post_ra>
// kernel: tpu_custom_call.1
= control target key start
LH: loop header
LB: loop body
LE: loop exit
PB: predicated region body
PF: predicated region fallthrough
CT: control target
= control target key end

     0   :  { %14 = vsyncpa [#allocation5], 0  ;;  %s1211_s0 = inlined_call_operand.hbm [shape: bf16[8,24], index: 0, kind: input, shape index: {}]   ;;  %s1212_s1 = inlined_call_operand.vmem [shape: bf16[8,8], index: 1, kind: input, shape index: {}]   ;;  %s1213_s2 = inlined_call_operand.hbm [shape: bf16[32,512], index: 2, kind: input, shape index: {}]   ;;  %s1214_s3 = inlined_call_operand.vmem [shape: f32[1,512], index: 3, kind: input, shape index: {}]   ;;  %s1215_s4 = inlined_call_operand.hbm [shape: bf16[512,256], index: 4, kind: input, shape index: {}]   ;;  %s1216_s5 = inlined_call_operand.vmem [shape: f32[1,256], index: 5, kind: input, shape index: {}]   ;;  %s1217_s6 = inlined_call_operand.vmem [shape: bf16[1,256], index: 6, kind: input, shape index: {}]   ;;  %s1218_s7 = inlined_call_operand.<no memory space> [shape: f32[1], index: 7, kind: input, shape index: {}]   ;;  %s1219_s8 = inlined_call_operand.hbm [shape: f32[1,1,8], index: 8, kind: output, shape index: {}]  }
   0x1   :  { %15 = vsyncpa [#allocation8], 0 }
   0x2   :  { %16 = vsyncpa [#allocation6], 0  ;;  %s1077_s27 = smov [#allocation7]   ;;  %s983_s9 = scalar_lea.hbm %s1213_s2, 1024 }
   0x3   :  { %s34_s28 = sshll.u32 %s1077_s27, 4  ;;  %p984_p0 = scmp.ne.s32.totalorder %s1213_s2, %s983_s9  ;;  %s35_s28 = int_to_ptr.vmem [resolvable:$true] %s34_s28 }
   0x4   :  { %p987_p1 = scmp.lt.u32.totalorder %s983_s9, %s1213_s2 }
   0x6   :  { %p989_p2 = pnand %p987_p1, %p984_p0 }
   0x8   :  { %992 = shalt.err (!%p989_p2)
}
   0x9   :  { %s993_s14 = scalar_lea.vmem %s35_s28, 1024  ;;  %p998_p4 = scmp.lt.s32.totalorder %s35_s28, %s35_s28 }
   0xa   :  { %p994_p3 = scmp.ne.s32.totalorder %s35_s28, %s993_s14  ;;  %p999_p5 = scmp.lt.s32.totalorder %s993_s14, %s993_s14 }
   0xc   :  { %p1000_p6 = por %p999_p5, %p998_p4 }
   0xe   :  { %p1001_p7 = pnand %p1000_p6, %p994_p3 }
  0x10   :  { %1004 = shalt.err (!%p1001_p7)
}
  0x11   :  { %s1078_s15 = smov 256   ;;  %s1079_s16 = smov 16  }
  0x12   :  { %40 = dma.hbm_to_vmem [thread:$0]  %s1213_s2, 1024, %s35_s28, [#allocation8], %s1078_s15, %s1078_s15, %s1079_s16  }
  0x13   :  { %s1080_s19 = smov [#allocation4]   ;;  %s1081_s21 = smov [#allocation9]  }
  0x14   :  { %s23_s20 = sshll.u32 %s1080_s19, 4  ;;  %s48_s22 = sshll.u32 %s1081_s21, 4  ;;  %s24_s20 = int_to_ptr.vmem [resolvable:$true] %s23_s20  ;;  %s49_s22 = int_to_ptr.vmem [resolvable:$true] %s48_s22 }
  0x15   :  { %s1005_s25 = scalar_lea.hbm %s1211_s0, 64 }
  0x16   :  { %p1006_p8 = scmp.ne.s32.totalorder %s1211_s0, %s1005_s25  ;;  %p1009_p9 = scmp.lt.u32.totalorder %s1005_s25, %s1211_s0 }
  0x18   :  { %p1011_p10 = pnand %p1009_p9, %p1006_p8 }
  0x1a   :  { %1014 = shalt.err (!%p1011_p10)
}
  0x1b   :  { %s1015_s2 = scalar_lea.vmem %s24_s20, 64  ;;  %p1020_p12 = scmp.lt.s32.totalorder %s24_s20, %s24_s20 }
  0x1c   :  { %p1016_p11 = scmp.ne.s32.totalorder %s24_s20, %s1015_s2  ;;  %p1021_p13 = scmp.lt.s32.totalorder %s1015_s2, %s1015_s2 }
  0x1e   :  { %p1022_p0 = por %p1021_p13, %p1020_p12 }
  0x20   :  { %p1023_p1 = pnand %p1022_p0, %p1016_p11 }
  0x22   :  { %1026 = shalt.err (!%p1023_p1)
}
  0x23   :  { %26 = dma.hbm_to_vmem [thread:$0]  %s1211_s0, 64, %s24_s20, [#allocation5]  }
  0x24   :  { %s1027_s12 = scalar_lea.hbm %s1215_s4, 8192 }
  0x25   :  { %p1028_p2 = scmp.ne.s32.totalorder %s1215_s4, %s1027_s12  ;;  %p1031_p3 = scmp.lt.u32.totalorder %s1027_s12, %s1215_s4 }
  0x27   :  { %p1033_p4 = pnand %p1031_p3, %p1028_p2 }
  0x29   :  { %1036 = shalt.err (!%p1033_p4)
}
  0x2a   :  { %s1037_s17 = scalar_lea.vmem %s49_s22, 8192  ;;  %p1042_p6 = scmp.lt.s32.totalorder %s49_s22, %s49_s22 }
  0x2b   :  { %p1038_p5 = scmp.ne.s32.totalorder %s49_s22, %s1037_s17  ;;  %p1043_p7 = scmp.lt.s32.totalorder %s1037_s17, %s1037_s17 }
  0x2d   :  { %p1044_p8 = por %p1043_p7, %p1042_p6 }
  0x2f   :  { %p1045_p9 = pnand %p1044_p8, %p1038_p5 }
  0x31   :  { %1048 = shalt.err (!%p1045_p9)
}
  0x32   :  { %s1082_s0 = smov 128   ;;  %s1083_s18 = smov 8  }
  0x33   :  { %54 = dma.hbm_to_vmem [thread:$0]  %s1215_s4, 8192, %s49_s22, [#allocation8], %s1082_s0, %s1082_s0, %s1083_s18  }
  0x34   :  { %1071 = dma.done.wait [#allocation5], 64  }
  0x35   :  { %1072 = vsyncadd [#allocation5], 4294967232 }
  0x36   :  { %1073 = dma.done.wait [#allocation8], 9216  }
  0x37   :  { %1074 = vsyncadd [#allocation8], 4294958080  ;;  %v1084_v0 = vmov 0   ;;  %vm72_vm0 = vcmask 191488   ;;  %v74_v1 = vld [vmem:[%s1212_s1] sm:$0xf] }
  0x38   :  { %188 = vmatprep.mubr.bf16.mxu0 %v1084_v0  ;;  %229 = vmatprep.mubr.bf16.mxu1 %v1084_v0  ;;  %v71_v2 = vld [vmem:[#allocation4] sm:$0xf]  ;;  %s1085_s24 = smov 24   ;;  %v875_v3 = vld [vmem:[#allocation7 + $0x4] ss:$16 sps:$4 sm:$0xff]   ;;  %vm79_vm1 = vcmask 257216  }
  0x39   :  { %76 = vrot.lane.b32.xlu0 %v74_v1, %s1085_s24  ;;  %73 = vst.msk [vmem:[#allocation2] sm:$0xf] %vm72_vm0, %v71_v2  ;;  %v877_v4 = vld [vmem:[#allocation7 + $0xc] ss:$16 sps:$4 sm:$0xff]   ;;  %v879_v5 = vld [vmem:[#allocation7] ss:$16 sps:$4 sm:$0xff]   ;;  %156 = vmatprep.subr.bf16.mxu0 %v875_v3 }
  0x3a   :  { %v880_v6 = vld [vmem:[#allocation7 + $0x8] ss:$16 sps:$4 sm:$0xff]   ;;  %197 = vmatprep.subr.bf16.mxu1 %v877_v4  ;;  %157 = vmatpush1.bf16.msra.mxu0 %v879_v5  ;;  %v881_v7 = vld [vmem:[#allocation7 + $0x24] ss:$16 sps:$4 sm:$0xff]   ;;  %v883_v8 = vld [vmem:[#allocation7 + $0x2c] ss:$16 sps:$4 sm:$0xff]  }
  0x3b   :  { %198 = vmatpush1.bf16.msra.mxu1 %v880_v6  ;;  %v885_v9 = vld [vmem:[#allocation7 + $0x20] ss:$16 sps:$4 sm:$0xff]   ;;  %v886_v10 = vld [vmem:[#allocation7 + $0x28] ss:$16 sps:$4 sm:$0xff]   ;;  %158 = vmatprep.subr.bf16.mxu0 %v881_v7  ;;  %v889_v11 = vld [vmem:[#allocation9 + $0x4] ss:$8 sps:$4 sm:$0xff]  }
  0x3c   :  { %199 = vmatprep.subr.bf16.mxu1 %v883_v8  ;;  %v892_v12 = vld [vmem:[#allocation9 + $0x104] ss:$8 sps:$4 sm:$0xff]   ;;  %vm152_vm2 = vcmask 261120   ;;  %v887_v14 = vld [vmem:[#allocation9] ss:$8 sps:$4 sm:$0xff]   ;;  %s1086_s27 = smov [#allocation10]  }
  0x3d   :  { %v890_v15 = vld [vmem:[#allocation9 + $0x100] ss:$8 sps:$4 sm:$0xff]   ;;  %v895_v16 = vld [vmem:[#allocation9 + $0x14] ss:$8 sps:$4 sm:$0xff]   ;;  %v893_v19 = vld [vmem:[#allocation9 + $0x10] ss:$8 sps:$4 sm:$0xff]  }
  0x3e   :  { %159 = vmatpush1.bf16.msra.mxu0 %v885_v9  ;;  %v898_v17 = vld [vmem:[#allocation9 + $0x114] ss:$8 sps:$4 sm:$0xff]   ;;  %v896_v20 = vld [vmem:[#allocation9 + $0x110] ss:$8 sps:$4 sm:$0xff]   ;;  %v901_v21 = vld [vmem:[#allocation9 + $0x24] ss:$8 sps:$4 sm:$0xff]  }
  0x3f   :  { %200 = vmatpush1.bf16.msra.mxu1 %v886_v10  ;;  %687 = vmatprep.subr.bf16.mxu0 %v892_v12  ;;  %v904_v22 = vld [vmem:[#allocation9 + $0x124] ss:$8 sps:$4 sm:$0xff]   ;;  %v899_v23 = vld [vmem:[#allocation9 + $0x20] ss:$8 sps:$4 sm:$0xff]   ;;  %v907_v25 = vld [vmem:[#allocation9 + $0x34] ss:$8 sps:$4 sm:$0xff]  }
  0x40   :  { %646 = vmatprep.subr.bf16.mxu1 %v889_v11  ;;  %v902_v24 = vld [vmem:[#allocation9 + $0x120] ss:$8 sps:$4 sm:$0xff]   ;;  %v910_v26 = vld [vmem:[#allocation9 + $0x134] ss:$8 sps:$4 sm:$0xff]   ;;  %v905_v27 = vld [vmem:[#allocation9 + $0x30] ss:$8 sps:$4 sm:$0xff]  }
  0x41   :  { %v908_v28 = vld [vmem:[#allocation9 + $0x130] ss:$8 sps:$4 sm:$0xff]   ;;  %v913_v29 = vld [vmem:[#allocation9 + $0x44] ss:$8 sps:$4 sm:$0xff]   ;;  %v911_v31 = vld [vmem:[#allocation9 + $0x40] ss:$8 sps:$4 sm:$0xff]  }
  0x42   :  { %v916_v30 = vld [vmem:[#allocation9 + $0x144] ss:$8 sps:$4 sm:$0xff]   ;;  %v914_v32 = vld [vmem:[#allocation9 + $0x140] ss:$8 sps:$4 sm:$0xff]   ;;  %v919_v33 = vld [vmem:[#allocation9 + $0x54] ss:$8 sps:$4 sm:$0xff]  }
  0x43   :  { %v922_v34 = vld [vmem:[#allocation9 + $0x154] ss:$8 sps:$4 sm:$0xff]   ;;  %v917_v35 = vld [vmem:[#allocation9 + $0x50] ss:$8 sps:$4 sm:$0xff]   ;;  %v925_v37 = vld [vmem:[#allocation9 + $0x64] ss:$8 sps:$4 sm:$0xff]  }
  0x44   :  { %v920_v36 = vld [vmem:[#allocation9 + $0x150] ss:$8 sps:$4 sm:$0xff]   ;;  %v928_v38 = vld [vmem:[#allocation9 + $0x164] ss:$8 sps:$4 sm:$0xff]   ;;  %v923_v39 = vld [vmem:[#allocation9 + $0x60] ss:$8 sps:$4 sm:$0xff]  }
  0x45   :  { %v926_v40 = vld [vmem:[#allocation9 + $0x160] ss:$8 sps:$4 sm:$0xff]   ;;  %v931_v41 = vld [vmem:[#allocation9 + $0x74] ss:$8 sps:$4 sm:$0xff]   ;;  %v929_v43 = vld [vmem:[#allocation9 + $0x70] ss:$8 sps:$4 sm:$0xff]  }
  0x46   :  { %v934_v42 = vld [vmem:[#allocation9 + $0x174] ss:$8 sps:$4 sm:$0xff]   ;;  %v932_v44 = vld [vmem:[#allocation9 + $0x170] ss:$8 sps:$4 sm:$0xff]   ;;  %v937_v45 = vld [vmem:[#allocation9 + $0x84] ss:$8 sps:$4 sm:$0xff]  }
  0x47   :  { %v940_v46 = vld [vmem:[#allocation9 + $0x184] ss:$8 sps:$4 sm:$0xff]   ;;  %v935_v47 = vld [vmem:[#allocation9 + $0x80] ss:$8 sps:$4 sm:$0xff]   ;;  %v943_v49 = vld [vmem:[#allocation9 + $0x94] ss:$8 sps:$4 sm:$0xff]  }
  0x48   :  { %v938_v48 = vld [vmem:[#allocation9 + $0x180] ss:$8 sps:$4 sm:$0xff]   ;;  %v946_v50 = vld [vmem:[#allocation9 + $0x194] ss:$8 sps:$4 sm:$0xff]   ;;  %v941_v51 = vld [vmem:[#allocation9 + $0x90] ss:$8 sps:$4 sm:$0xff]  }
  0x49   :  { %v944_v52 = vld [vmem:[#allocation9 + $0x190] ss:$8 sps:$4 sm:$0xff]   ;;  %v949_v53 = vld [vmem:[#allocation9 + $0xa4] ss:$8 sps:$4 sm:$0xff]   ;;  %v947_v55 = vld [vmem:[#allocation9 + $0xa0] ss:$8 sps:$4 sm:$0xff]  }
  0x4a   :  { %v952_v54 = vld [vmem:[#allocation9 + $0x1a4] ss:$8 sps:$4 sm:$0xff]   ;;  %v950_v56 = vld [vmem:[#allocation9 + $0x1a0] ss:$8 sps:$4 sm:$0xff]   ;;  %v955_v57 = vld [vmem:[#allocation9 + $0xb4] ss:$8 sps:$4 sm:$0xff]  }
  0x4b   :  { %v958_v58 = vld [vmem:[#allocation9 + $0x1b4] ss:$8 sps:$4 sm:$0xff]   ;;  %v953_v59 = vld [vmem:[#allocation9 + $0xb0] ss:$8 sps:$4 sm:$0xff]   ;;  %v961_v61 = vld [vmem:[#allocation9 + $0xc4] ss:$8 sps:$4 sm:$0xff]  }
  0x4c   :  { %v956_v60 = vld [vmem:[#allocation9 + $0x1b0] ss:$8 sps:$4 sm:$0xff]   ;;  %v964_v62 = vld [vmem:[#allocation9 + $0x1c4] ss:$8 sps:$4 sm:$0xff]   ;;  %v959_v63 = vld [vmem:[#allocation9 + $0xc0] ss:$8 sps:$4 sm:$0xff]  }
  0x4d   :  { %v962_v0 = vld [vmem:[#allocation9 + $0x1c0] ss:$8 sps:$4 sm:$0xff]   ;;  %v967_v1 = vld [vmem:[#allocation9 + $0xd4] ss:$8 sps:$4 sm:$0xff]   ;;  %v965_v3 = vld [vmem:[#allocation9 + $0xd0] ss:$8 sps:$4 sm:$0xff]  }
  0x4e   :  { %v970_v2 = vld [vmem:[#allocation9 + $0x1d4] ss:$8 sps:$4 sm:$0xff]   ;;  %v968_v4 = vld [vmem:[#allocation9 + $0x1d0] ss:$8 sps:$4 sm:$0xff]   ;;  %v973_v5 = vld [vmem:[#allocation9 + $0xe4] ss:$8 sps:$4 sm:$0xff]  }
  0x4f   :  { %v976_v6 = vld [vmem:[#allocation9 + $0x1e4] ss:$8 sps:$4 sm:$0xff]   ;;  %v971_v7 = vld [vmem:[#allocation9 + $0xe0] ss:$8 sps:$4 sm:$0xff]   ;;  %v979_v9 = vld [vmem:[#allocation9 + $0xf4] ss:$8 sps:$4 sm:$0xff]  }
  0x50   :  { %v974_v8 = vld [vmem:[#allocation9 + $0x1e0] ss:$8 sps:$4 sm:$0xff]   ;;  %v982_v10 = vld [vmem:[#allocation9 + $0x1f4] ss:$8 sps:$4 sm:$0xff]   ;;  %v977_v11 = vld [vmem:[#allocation9 + $0xf0] ss:$8 sps:$4 sm:$0xff]  }
  0x51   :  { %v980_v12 = vld [vmem:[#allocation9 + $0x1f0] ss:$8 sps:$4 sm:$0xff]   ;;  %s777_s29 = sshll.u32 %s1086_s27, 4  ;;  %vm769_vm3 = vcmask 57344   ;;  %s778_s29 = int_to_ptr.vmem [resolvable:$true] %s777_s29 }
  0x52   :  { %s1049_s30 = scalar_lea.vmem %s778_s29, 16  ;;  %s1053_s2 = scalar_lea.vmem %s778_s29, 32 }
  0x53   :  { %p1050_p10 = scmp.ne.s32.totalorder %s778_s29, %s1049_s30  ;;  %p1054_p11 = scmp.lt.s32.totalorder %s778_s29, %s778_s29 }
  0x54   :  { %p1055_p12 = scmp.lt.s32.totalorder %s1053_s2, %s1049_s30 }
  0x56   :  { %p1056_p13 = por %p1055_p12, %p1054_p11 }
  0x58   :  { %p1057_p0 = pnand %p1056_p13, %p1050_p10 }
  0xab   :  { %v77_v13 = vpop.permute.xlu0 %76 }
  0xac   :  { %80 = vst.msk [vmem:[#allocation2] sm:$0xf] %vm79_vm1, %v77_v13  ;;  %v92_v13 = vlaneseq }
  0xb3   :  { %v81_v18 = vld [vmem:[#allocation2] sm:$0xf] }
  0xb4   :  { %795 = vmatmul.mubr.msk.bf16.vlgmr.msra.gmra.mrb[0].mxu0 %vm152_vm2, %v81_v18  ;;  %796 = vmatmul.mubr.msk.bf16.vlgmr.msra.gmra.mrb[0].mxu1 %vm152_vm2, %v81_v18 }
  0xb5   :  { %647 = vmatpush1.bf16.msra.mxu1 %v887_v14  ;;  %688 = vmatpush1.bf16.msra.mxu0 %v890_v15  ;;  %v1172_v14 = vshrl.u32 %v92_v13, 7 }
  0xb6   :  { %648 = vmatprep.subr.bf16.mxu1 %v895_v16  ;;  %689 = vmatprep.subr.bf16.mxu0 %v898_v17  ;;  %v90_v17 = vld [vmem:[%s1214_s3] sm:$0xf] }
  0xb7   :  { %v1175_v15 = vsub.s32 0, %v1172_v14  ;;  %v102_v16 = vsub.s32 2, %v1172_v14  ;;  %v98_v18 = vsub.s32 1, %v1172_v14 }
  0xb9   :  { %649 = vmatpush1.bf16.msra.mxu1 %v893_v19  ;;  %690 = vmatpush1.bf16.msra.mxu0 %v896_v20  ;;  %v106_v19 = vsub.s32 3, %v1172_v14  ;;  %v95_v20 = vrot.slane %v90_v17, %v1175_v15 }
  0xba   :  { %650 = vmatprep.subr.bf16.mxu1 %v901_v21  ;;  %691 = vmatprep.subr.bf16.mxu0 %v904_v22  ;;  %v103_v21 = vrot.slane %v90_v17, %v102_v16  ;;  %v99_v22 = vrot.slane %v90_v17, %v98_v18 }
  0xbd   :  { %651 = vmatpush1.bf16.msra.mxu1 %v899_v23  ;;  %692 = vmatpush1.bf16.msra.mxu0 %v902_v24  ;;  %v107_v23 = vrot.slane %v90_v17, %v106_v19 }
  0xbe   :  { %652 = vmatprep.subr.bf16.mxu1 %v907_v25  ;;  %693 = vmatprep.subr.bf16.mxu0 %v910_v26 }
  0xc1   :  { %653 = vmatpush1.bf16.msra.mxu1 %v905_v27  ;;  %694 = vmatpush1.bf16.msra.mxu0 %v908_v28 }
  0xc2   :  { %654 = vmatprep.subr.bf16.mxu1 %v913_v29  ;;  %695 = vmatprep.subr.bf16.mxu0 %v916_v30 }
  0xc5   :  { %655 = vmatpush1.bf16.msra.mxu1 %v911_v31  ;;  %696 = vmatpush1.bf16.msra.mxu0 %v914_v32 }
  0xc6   :  { %656 = vmatprep.subr.bf16.mxu1 %v919_v33  ;;  %697 = vmatprep.subr.bf16.mxu0 %v922_v34 }
  0xc9   :  { %657 = vmatpush1.bf16.msra.mxu1 %v917_v35  ;;  %698 = vmatpush1.bf16.msra.mxu0 %v920_v36 }
  0xca   :  { %658 = vmatprep.subr.bf16.mxu1 %v925_v37  ;;  %699 = vmatprep.subr.bf16.mxu0 %v928_v38 }
  0xcd   :  { %659 = vmatpush1.bf16.msra.mxu1 %v923_v39  ;;  %700 = vmatpush1.bf16.msra.mxu0 %v926_v40 }
  0xce   :  { %660 = vmatprep.subr.bf16.mxu1 %v931_v41  ;;  %701 = vmatprep.subr.bf16.mxu0 %v934_v42 }
  0xd1   :  { %661 = vmatpush1.bf16.msra.mxu1 %v929_v43  ;;  %702 = vmatpush1.bf16.msra.mxu0 %v932_v44 }
  0xd2   :  { %662 = vmatprep.subr.bf16.mxu1 %v937_v45  ;;  %703 = vmatprep.subr.bf16.mxu0 %v940_v46 }
  0xd5   :  { %663 = vmatpush1.bf16.msra.mxu1 %v935_v47  ;;  %704 = vmatpush1.bf16.msra.mxu0 %v938_v48  ;;  %v732_v48 = vld [vmem:[%s1217_s6] sm:$0x3] }
  0xd6   :  { %664 = vmatprep.subr.bf16.mxu1 %v943_v49  ;;  %705 = vmatprep.subr.bf16.mxu0 %v946_v50  ;;  %v314_v49 = vld [vmem:[%s1216_s5] sm:$0x3]  ;;  %v733_v50 = vunpack.c.l.bf16 %v732_v48 }
  0xd9   :  { %665 = vmatpush1.bf16.msra.mxu1 %v941_v51  ;;  %706 = vmatpush1.bf16.msra.mxu0 %v944_v52  ;;  %v319_v51 = vrot.slane %v314_v49, %v1175_v15  ;;  %v323_v52 = vrot.slane %v314_v49, %v98_v18 }
  0xda   :  { %666 = vmatprep.subr.bf16.mxu1 %v949_v53  ;;  %707 = vmatprep.subr.bf16.mxu0 %v952_v54 }
  0xdd   :  { %667 = vmatpush1.bf16.msra.mxu1 %v947_v55  ;;  %708 = vmatpush1.bf16.msra.mxu0 %v950_v56 }
  0xde   :  { %668 = vmatprep.subr.bf16.mxu1 %v955_v57  ;;  %709 = vmatprep.subr.bf16.mxu0 %v958_v58  ;;  %v738_v58 = vrot.slane %v733_v50, %v1175_v15 }
  0xe1   :  { %669 = vmatpush1.bf16.msra.mxu1 %v953_v59  ;;  %710 = vmatpush1.bf16.msra.mxu0 %v956_v60  ;;  %v742_v59 = vrot.slane %v733_v50, %v102_v16  ;;  %v759_v16 = vstv %s1218_s7 }
  0xe2   :  { %670 = vmatprep.subr.bf16.mxu1 %v961_v61  ;;  %711 = vmatprep.subr.bf16.mxu0 %v964_v62 }
  0xe5   :  { %671 = vmatpush1.bf16.msra.mxu1 %v959_v63  ;;  %712 = vmatpush1.bf16.msra.mxu0 %v962_v0 }
  0xe6   :  { %672 = vmatprep.subr.bf16.mxu1 %v967_v1  ;;  %713 = vmatprep.subr.bf16.mxu0 %v970_v2 }
  0xe9   :  { %673 = vmatpush1.bf16.msra.mxu1 %v965_v3  ;;  %714 = vmatpush1.bf16.msra.mxu0 %v968_v4  ;;  %v748_v4 = vrot.slane %v738_v58, %v1175_v15 }
  0xea   :  { %674 = vmatprep.subr.bf16.mxu1 %v973_v5  ;;  %715 = vmatprep.subr.bf16.mxu0 %v976_v6  ;;  %v752_v6 = vrot.slane %v742_v59, %v1175_v15 }
  0xed   :  { %675 = vmatpush1.bf16.msra.mxu1 %v971_v7  ;;  %716 = vmatpush1.bf16.msra.mxu0 %v974_v8 }
  0xee   :  { %676 = vmatprep.subr.bf16.mxu1 %v979_v9  ;;  %717 = vmatprep.subr.bf16.mxu0 %v982_v10 }
  0xf1   :  { %677 = vmatpush1.bf16.msra.mxu1 %v977_v11  ;;  %718 = vmatpush1.bf16.msra.mxu0 %v980_v12  ;;  %v763_v12 = vand.u32 127, %v92_v13 }
  0xf3   :  { %v766_v17 = vsub.s32 %v763_v12, %v1172_v14 }
 0x187   :  { %v190_v24 = vpop.f32.mrb[0].mxu0  ;;  %v231_v25 = vpop.f32.mrb[0].mxu1 }
 0x188   :  { %v191_v26 = vadd.f32 %v190_v24, %v95_v20  ;;  %v232_v27 = vadd.f32 %v231_v25, %v103_v21  ;;  %v192_v28 = vpop.f32.mrb[1].mxu0  ;;  %v233_v29 = vpop.f32.mrb[1].mxu1 }
 0x189   :  { %v193_v30 = vadd.f32 %v192_v28, %v99_v22  ;;  %v234_v31 = vadd.f32 %v233_v29, %v107_v23  ;;  %v194_v32 = vpop.f32.mrb[2].mxu0  ;;  %v235_v33 = vpop.f32.mrb[2].mxu1 }
 0x18a   :  { %v238_v34 = vmul.f32 0.2, %v191_v26  ;;  %v240_v35 = vmul.f32 0.2, %v232_v27  ;;  %v195_v36 = vpop.f32.mrb[3].mxu0  ;;  %v236_v37 = vpop.f32.mrb[3].mxu1 }
 0x18b   :  { %v239_v38 = vmul.f32 0.2, %v193_v30  ;;  %v241_v39 = vmul.f32 0.2, %v234_v31 }
 0x18c   :  { %v242_v40 = vmax.f32 %v191_v26, %v238_v34  ;;  %v244_v41 = vmax.f32 %v232_v27, %v240_v35 }
 0x18d   :  { %v243_v42 = vmax.f32 %v193_v30, %v239_v38  ;;  %v245_v43 = vmax.f32 %v234_v31, %v241_v39 }
 0x18e   :  { %v246_v46 = vpack.c.bf16 %v242_v40, %v242_v40  ;;  %v248_v47 = vpack.c.bf16 %v244_v41, %v244_v41 }
 0x18f   :  { %v247_v44 = vpack.c.bf16 %v243_v42, %v243_v42  ;;  %v249_v45 = vpack.c.bf16 %v245_v43, %v245_v43 }
 0x191   :  { %678 = vmatprep.mubr.bf16.mxu1 %v247_v44  ;;  %719 = vmatprep.mubr.bf16.mxu0 %v249_v45 }
 0x192   :  { %679 = vmatmul.mubr.bf16.vlgmr.msra.gmra.mrb[4].mxu1 %v246_v46  ;;  %720 = vmatmul.mubr.bf16.vlgmr.msra.gmra.mrb[4].mxu0 %v248_v47 }
 0x265   :  { %v680_v53 = vpop.f32.mrb[4].mxu1  ;;  %v721_v54 = vpop.f32.mrb[4].mxu0 }
 0x266   :  { %v681_v55 = vadd.f32 %v680_v53, %v319_v51  ;;  %v682_v56 = vpop.f32.mrb[5].mxu1  ;;  %v723_v57 = vpop.f32.mrb[5].mxu0 }
 0x267   :  { %v683_v60 = vadd.f32 %v682_v56, %v323_v52  ;;  %v684_v61 = vpop.f32.mrb[6].mxu1  ;;  %v725_v62 = vpop.f32.mrb[6].mxu0 }
 0x268   :  { %v722_v63 = vadd.f32 %v721_v54, %v681_v55  ;;  %v685_v0 = vpop.f32.mrb[7].mxu1  ;;  %v726_v1 = vpop.f32.mrb[7].mxu0 }
 0x269   :  { %v724_v2 = vadd.f32 %v723_v57, %v683_v60 }
 0x26a   :  { %v728_v3 = vmul.f32 0.2, %v722_v63 }
 0x26b   :  { %v729_v5 = vmul.f32 0.2, %v724_v2 }
 0x26c   :  { %v730_v7 = vmax.f32 %v722_v63, %v728_v3 }
 0x26d   :  { %v731_v8 = vmax.f32 %v724_v2, %v729_v5 }
 0x26e   :  { %v753_v9 = vmul.f32 %v748_v4, %v730_v7 }
 0x26f   :  { %v754_v10 = vmul.f32 %v752_v6, %v731_v8 }
 0x271   :  { %v755_v11 = vadd.f32 %v754_v10, %v753_v9 }
 0x273   :  { %756 = vadd.xlane.f32.xlu0 %v755_v11 }
 0x300   :  { %v757_v18 = vpop.xlane.xlu0 %756 }
 0x301   :  { %v760_v19 = vadd.f32 %v759_v16, %v757_v18 }
 0x303   :  { %v767_v15 = vrot.slane %v760_v19, %v766_v17 }
 0x305   :  { %770 = vst.msk [vmem:[#allocation10] sm:$0x1] %vm769_vm3, %v767_v15 }
 0x306   :  { %1060 = shalt.err (!%p1057_p0)
}
 0x307   :  { %s1061_s9 = scalar_lea.hbm %s1219_s8, 16 }
 0x308   :  { %p1062_p1 = scmp.ne.s32.totalorder %s1219_s8, %s1061_s9  ;;  %p1065_p2 = scmp.lt.u32.totalorder %s1061_s9, %s1219_s8 }
 0x30a   :  { %p1067_p3 = pnand %p1065_p2, %p1062_p1 }
 0x30c   :  { %1070 = shalt.err (!%p1067_p3)
}
 0x30d   :  { %780 = dma.vmem_to_hbm [thread:$0]  %s778_s29, 16, %s1219_s8, [#allocation6]  }
 0x30e   :  { %1075 = dma.done.wait [#allocation6], 16  }
 0x30f   :  { %1076 = vsyncadd [#allocation6], 4294967280 }
 0x310   :  { %784 = vsyncpa [#allocation5], 1 }
 0x311   :  { %785 = vsyncpa [#allocation8], 1 }
 0x312   :  { %786 = vsyncpa [#allocation6], 1 }

</bundles_post_ra>
